<compile_context>
chip_gen: v7x
topology: tpu7x:2x2x1
jax: 0.10.0
libtpu: 0.0.40
codegen_flags: <defaults>
</compile_context>

<pallas_src>
import functools

import jax
import jax.numpy as jnp
from jax.experimental import pallas as pl
from jax.experimental.pallas import tpu as pltpu

_LANES = 128
# Row-tile candidates (multiples of 8, capped at 4096 rows = 2 MiB f32/buffer).
_TILE_CANDIDATES = (4096, 2048, 1024, 512, 256, 128, 64, 32, 16, 8)


def _round_up(x: int, m: int) -> int:
    return ((x + m - 1) // m) * m


def _pick_row_tile(rows: int) -> int:
    """Largest row tile that divides `rows`, preferring >=2 grid steps."""
    cands = [t for t in _TILE_CANDIDATES if t <= rows and rows % t == 0]
    if not cands:
        return rows  # single full-array block (rows not a multiple of 8)
    if rows >= 16:
        multi = [t for t in cands if rows // t >= 2]
        if multi:
            return multi[0]  # largest tile that still yields >= 2 parallel steps
    return cands[0]


def _random_policy_kernel(use_hw_prng, seed_ref, out_ref):
    """Fill out_ref (tb, 128) with uniform float32 values in [-1, 1)."""
    tb, lanes = out_ref.shape
    pid = pl.program_id(0)

    if use_hw_prng:
        # Hardware PRNG: per-tile seed, one bits draw for the whole tile.
        pltpu.prng_seed(seed_ref[0] + pid)
        bits = pltpu.bitcast(pltpu.prng_random_bits((tb, lanes)), jnp.uint32)
    else:
        # Interpret/CPU fallback: 2-round splitmix-style counter hash.
        row = jax.lax.broadcasted_iota(jnp.uint32, (tb, lanes), 0)
        lane = jax.lax.broadcasted_iota(jnp.uint32, (tb, lanes), 1)
        # Fold the per-tile row offset and the seed into a single scalar.
        off = ((pid * tb).astype(jnp.uint32) << jnp.uint32(7)) + (
            seed_ref[0].astype(jnp.uint32) * jnp.uint32(0x9E3779B9)
        )
        x = (row << jnp.uint32(7)) + lane + off
        x = x ^ (x >> jnp.uint32(16))
        x = x * jnp.uint32(0x7FEB352D)
        x = x ^ (x >> jnp.uint32(15))
        x = x * jnp.uint32(0x846CA68B)
        x = x ^ (x >> jnp.uint32(16))
        bits = x

    # Top 24 bits -> uniform in [-1, 1): shift, convert, one fused mul/sub.
    u24 = (bits >> jnp.uint32(8)).astype(jnp.int32)  # 0 .. 2^24 - 1
    out_ref[...] = u24.astype(jnp.float32) * jnp.float32(2.0 ** -23) - jnp.float32(1.0)


@functools.partial(jax.jit, static_argnums=(1, 2))
def _random_actions(seed_arr: jax.Array, total: int, use_hw_prng: bool) -> jax.Array:
    """Returns `total` uniform values in [-1, 1) as a flat float32 vector."""
    rows_needed = max(1, pl.cdiv(total, _LANES))
    if total % _LANES == 0:
        rows, need_slice = rows_needed, False  # pure reshape view, no extra copy
    else:
        rows, need_slice = max(8, _round_up(rows_needed, 8)), True

    tb = _pick_row_tile(rows)
    grid = (rows // tb,)

    out = pl.pallas_call(
        functools.partial(_random_policy_kernel, use_hw_prng),
        out_shape=jax.ShapeDtypeStruct((rows, _LANES), jnp.float32),
        grid=grid,
        in_specs=[pl.BlockSpec(memory_space=pltpu.MemorySpace.SMEM)],
        out_specs=pl.BlockSpec((tb, _LANES), lambda i: (i, 0)),
        compiler_params=pltpu.CompilerParams(
            dimension_semantics=("parallel",),
        ),
        cost_estimate=pl.CostEstimate(
            flops=(4 if use_hw_prng else 10) * rows * _LANES,
            transcendentals=0,
            bytes_accessed=rows * _LANES * 4,
        ),
    )(seed_arr)

    flat = out.reshape(-1)
    if need_slice:
        flat = flat[:total]
    return flat


def random_policy_forward(obs: jax.Array, action_dim: int, seed=0):
    """Pallas implementation of RandomPolicy.forward.

    Args:
      obs: observation tensor, NCHW layout (only batch dim is used).
      action_dim: number of action dimensions.
      seed: int or device jax.Array scalar; pass a pre-built device array and a
        new value per step to avoid per-call H2D transfers and get fresh actions.

    Returns:
      (actions, 0) with actions of shape (batch, action_dim), dtype float32,
      values in [-1, 1).
    """
    batch = obs.shape[0]
    total = batch * action_dim

    if isinstance(seed, jax.Array):
        seed_arr = seed.astype(jnp.int32).reshape((1,))
    else:
        seed_arr = jnp.asarray([seed], dtype=jnp.int32)

    use_hw_prng = jax.default_backend() == "tpu"
    flat = _random_actions(seed_arr, total, use_hw_prng)
    actions = flat.reshape(batch, action_dim)
    return actions, 0


if __name__ == "__main__":
    key = jax.random.PRNGKey(0)
    # Small, module-consistent input: batch=2, channels=4, spatial=16 (NCHW).
    obs = jax.random.normal(key, (2, 4, 16, 16), dtype=jnp.float32)
    action_dim = 8

    # Build device seed scalars once (outside the per-step path).
    seed0 = jnp.asarray(0, dtype=jnp.int32)
    seed1 = jnp.asarray(1, dtype=jnp.int32)

    actions, extra = random_policy_forward(obs, action_dim, seed=seed0)
    actions = jax.block_until_ready(actions)

    assert actions.shape == (2, action_dim)
    assert actions.dtype == jnp.float32
    assert extra == 0
    # Values must lie in [-1, 1) like 2*(rand-0.5).
    assert bool(jnp.all(actions >= -1.0)) and bool(jnp.all(actions < 1.0))

    # Different seeds produce different actions.
    actions2, _ = random_policy_forward(obs, action_dim, seed=seed1)
    actions2 = jax.block_until_ready(actions2)
    assert not bool(jnp.all(actions == actions2))

    # Also exercise a lane-exact total (no trailing slice path): batch=8, dim=128.
    obs_big = jax.random.normal(key, (8, 4, 16, 16), dtype=jnp.float32)
    big, _ = random_policy_forward(obs_big, 128, seed=seed0)
    big = jax.block_until_ready(big)
    assert big.shape == (8, 128)
    assert bool(jnp.all(big >= -1.0)) and bool(jnp.all(big < 1.0))

    print("KERNEL_OK")
</pallas_src>

<mosaic_0001>
module attributes {stable_mosaic.version = 11 : i64} {
  func.func @_random_policy_kernel(%arg0: i32, %arg1: memref<1xi32, #tpu.memory_space<smem>>, %arg2: memref<8x128xf32, #tpu.memory_space<vmem>>) attributes {dimension_semantics = [#tpu.dimension_semantics<parallel>], iteration_bounds = array<i64: 1>, scalar_prefetch = 0 : i64, scratch_operands = 0 : i64, tpu.core_type = #tpu.core_type<tc>, window_params = [{transform_indices = @transform_0, window_bounds = array<i64: 1>}, {transform_indices = @transform_1, window_bounds = array<i64: 8, 128>}]} {
    %0 = tpu.iota {dimensions = array<i32: 0>} : vector<8x128xi32>
    %1 = tpu.iota {dimensions = array<i32: 1>} : vector<8x128xi32>
    %c8_i32 = arith.constant 8 : i32
    %2 = arith.muli %arg0, %c8_i32 : i32
    %c7_i32 = arith.constant 7 : i32
    %3 = arith.shli %2, %c7_i32 : i32
    %c0 = arith.constant 0 : index
    %4 = memref.load %arg1[%c0] : memref<1xi32, #tpu.memory_space<smem>>
    %c-1640531527_i32 = arith.constant -1640531527 : i32
    %5 = arith.muli %4, %c-1640531527_i32 : i32
    %6 = arith.addi %3, %5 : i32
    %c7_i32_0 = arith.constant 7 : i32
    %7 = vector.broadcast %c7_i32_0 : i32 to vector<8x128xi32>
    %8 = arith.shli %0, %7 : vector<8x128xi32>
    %9 = arith.addi %8, %1 : vector<8x128xi32>
    %10 = vector.broadcast %6 : i32 to vector<8x128xi32>
    %11 = arith.addi %9, %10 : vector<8x128xi32>
    %c16_i32 = arith.constant 16 : i32
    %12 = vector.broadcast %c16_i32 : i32 to vector<8x128xi32>
    %13 = arith.shrui %11, %12 : vector<8x128xi32>
    %14 = arith.xori %11, %13 : vector<8x128xi32>
    %c2146121005_i32 = arith.constant 2146121005 : i32
    %15 = vector.broadcast %c2146121005_i32 : i32 to vector<8x128xi32>
    %16 = arith.muli %14, %15 : vector<8x128xi32>
    %c15_i32 = arith.constant 15 : i32
    %17 = vector.broadcast %c15_i32 : i32 to vector<8x128xi32>
    %18 = arith.shrui %16, %17 : vector<8x128xi32>
    %19 = arith.xori %16, %18 : vector<8x128xi32>
    %c-2073254261_i32 = arith.constant -2073254261 : i32
    %20 = vector.broadcast %c-2073254261_i32 : i32 to vector<8x128xi32>
    %21 = arith.muli %19, %20 : vector<8x128xi32>
    %c16_i32_1 = arith.constant 16 : i32
    %22 = vector.broadcast %c16_i32_1 : i32 to vector<8x128xi32>
    %23 = arith.shrui %21, %22 : vector<8x128xi32>
    %24 = arith.xori %21, %23 : vector<8x128xi32>
    %c8_i32_2 = arith.constant 8 : i32
    %25 = vector.broadcast %c8_i32_2 : i32 to vector<8x128xi32>
    %26 = arith.shrui %24, %25 : vector<8x128xi32>
    %27 = arith.sitofp %26 : vector<8x128xi32> to vector<8x128xf32>
    %cst = arith.constant 1.1920929E-7 : f32
    %28 = vector.broadcast %cst : f32 to vector<8x128xf32>
    %29 = arith.mulf %27, %28 : vector<8x128xf32>
    %cst_3 = arith.constant 1.000000e+00 : f32
    %30 = vector.broadcast %cst_3 : f32 to vector<8x128xf32>
    %31 = arith.subf %29, %30 : vector<8x128xf32>
    %c0_4 = arith.constant 0 : index
    %c0_5 = arith.constant 0 : index
    %32 = vector.load %arg2[%c0_4, %c0_5] : memref<8x128xf32, #tpu.memory_space<vmem>>, vector<8x128xf32>
    tpu.vector_store %arg2[%c0_4, %c0_5], %31 {strides = array<i32>} : memref<8x128xf32, #tpu.memory_space<vmem>>, vector<8x128xf32>,
    return
  }
  func.func @transform_0(%arg0: i32) -> i32 {
    %c0_i32 = arith.constant 0 : i32
    %c0_i32_0 = arith.constant 0 : i32
    return %c0_i32 : i32
  }
  func.func @transform_1(%arg0: i32) -> (i32, i32) {
    %c0_i32 = arith.constant 0 : i32
    %c0_i32_0 = arith.constant 0 : i32
    return %arg0, %c0_i32 : i32, i32
  }
}

</mosaic_0001>

<bundles_post_ra>
// kernel: _random_actions.1
= control target key start
LH: loop header
LB: loop body
LE: loop exit
PB: predicated region body
PF: predicated region fallthrough
CT: control target
= control target key end

     0   :  { %v9_v0 = vlaneseq  ;;  %s56_s0 = inlined_call_operand.<no memory space> [shape: s32[1], index: 0, kind: input, shape index: {}]   ;;  %s57_s1 = inlined_call_operand.vmem [shape: f32[8,128], index: 1, kind: output, shape index: {}]  }
   0x1   :  { %s16_s8 = smul.u32 2654435769, %s56_s0 }
   0x2   :  { %v10_v1 = vshrl.u32 %v9_v0, 7  ;;  %v12_v2 = vand.u32 127, %v9_v0 }
   0x3   :  { %v20_v4 = vstv %s16_s8 }
   0x4   :  { %v18_v3 = vshll.u32 %v10_v1, 7 }
   0x6   :  { %v19_v5 = vadd.s32 %v18_v3, %v12_v2 }
   0x8   :  { %v21_v6 = vadd.s32 %v20_v4, %v19_v5 }
   0xa   :  { %v22_v7 = vshrl.u32 %v21_v6, 16 }
   0xc   :  { %v23_v8 = vxor.u32 %v22_v7, %v21_v6 }
   0xe   :  { %v24_v9 = vmul.u32 2146121005, %v23_v8 }
  0x10   :  { %v25_v10 = vshrl.u32 %v24_v9, 15 }
  0x12   :  { %v26_v11 = vxor.u32 %v25_v10, %v24_v9 }
  0x14   :  { %v27_v12 = vmul.u32 2221713035, %v26_v11 }
  0x16   :  { %v28_v13 = vshrl.u32 %v27_v12, 16 }
  0x18   :  { %v29_v14 = vxor.u32 %v28_v13, %v27_v12 }
  0x1a   :  { %v30_v15 = vshrl.u32 %v29_v14, 8 }
  0x1c   :  { %v31_v16 = vcvt.s32.f32 %v30_v15 }
  0x1e   :  { %v32_v17 = vmul.f32 1.1920929e-07, %v31_v16 }
  0x20   :  { %v39_v18 = vadd.f32 -1.0, %v32_v17 }
  0x22   :  { %34 = vst [vmem:[%s57_s1] sm:$0xff] %v39_v18 }

</bundles_post_ra>
